<compile_context>
chip_gen: v6e
topology: v6e:2x2x1
jax: 0.10.0
libtpu: 0.0.40
codegen_flags: <defaults>
</compile_context>

<pallas_src>
import functools

import jax
import jax.numpy as jnp
from jax.experimental import pallas as pl
from jax.experimental.pallas import tpu as pltpu


# ---------------------------------------------------------------------------
# Fused single-pass kernel: whole (Bt, C, HW) slabs per grid step.
# ---------------------------------------------------------------------------
def _se_kernel(x_ref, w1t_ref, w2t_ref, o_ref):
    # x_ref  : (Bt, C, HW)   channels on sublanes, flattened spatial on lanes
    # w1t_ref: (C, C_red)    first Linear weight, pre-transposed, f32
    # w2t_ref: (C_red, C)    second Linear weight, pre-transposed, f32

    # squeeze: AdaptiveAvgPool2d(1) == per-channel spatial mean, f32 accum.
    # Computed straight from the ref so the multi-MiB block is not kept live
    # across the excitation chain (no spill-sized temporary).
    y = jnp.mean(x_ref[...], axis=2, dtype=jnp.float32)          # (Bt, C)

    # excitation: Linear -> ReLU -> Linear -> Sigmoid (tiny MXU matmuls)
    h = jnp.maximum(
        jnp.dot(y, w1t_ref[...], preferred_element_type=jnp.float32), 0.0)
    s = jnp.dot(h, w2t_ref[...], preferred_element_type=jnp.float32)
    gate = jax.nn.sigmoid(s).astype(o_ref.dtype)                 # (Bt, C)

    # scale: re-read the input VMEM buffer (vld slots have plenty of slack),
    # multiply in the native dtype, broadcast gate along the lane axis.
    o_ref[...] = x_ref[...] * gate[:, :, None]


# ---------------------------------------------------------------------------
# Two-pass fallback for slabs too large for a single block.
# ---------------------------------------------------------------------------
def _pool_kernel(x_ref, sum_ref, *, hw_total, hw_tile):
    # x_ref: (1, C, hw_tile);  sum_ref: (1, C, 1) f32 accumulator over hw tiles
    t = pl.program_id(1)

    @pl.when(t == 0)
    def _init():
        sum_ref[...] = jnp.zeros_like(sum_ref)

    # Mask the padded tail of the last (partial) spatial tile before reducing.
    col = t * hw_tile + jax.lax.broadcasted_iota(jnp.int32, x_ref.shape, 2)
    x = jnp.where(col < hw_total, x_ref[...], 0)
    sum_ref[...] += jnp.sum(x, axis=2, keepdims=True, dtype=jnp.float32)


def _scale_kernel(x_ref, g_ref, o_ref):
    # x_ref: (1, C, hw_tile);  g_ref: (1, C, 1) gate in the activation dtype
    o_ref[...] = x_ref[...] * g_ref[...]


# ---------------------------------------------------------------------------
# Wrapper helpers
# ---------------------------------------------------------------------------
def _tpu_vmem_capacity_bytes():
    try:
        return int(pltpu.get_tpu_info().vmem_capacity_bytes)
    except Exception:
        return 64 << 20  # conservative (v7x-sized) default


def _budgets():
    cap = _tpu_vmem_capacity_bytes()
    if cap >= (100 << 20):          # v5e / v6e: 128 MiB physical VMEM, 1 TC
        max_block_bytes = 16 << 20  # larger blocks amortize per-step overhead
        vmem_clamp = 100 << 20
        min_steps = 3               # >=3 steps so the pipeline hides DMA
    else:                           # v7x-sized (64 MiB), 2 TCs share the grid
        max_block_bytes = 10 << 20  # prioritize step count over block size
        vmem_clamp = max(24 << 20, min(56 << 20, cap - (8 << 20)))
        min_steps = 6               # >= ~3 steps per TensorCore
    return max_block_bytes, vmem_clamp, min_steps


def _choose_bt(batch, per_batch_bytes, max_block_bytes, min_steps):
    """Largest Bt dividing B within the block budget, keeping enough steps."""
    need_steps = min(min_steps, batch)
    best = 1
    for bt in range(1, batch + 1):
        if batch % bt:
            continue
        if bt * per_batch_bytes > max_block_bytes:
            continue
        if batch // bt < need_steps:
            continue
        best = max(best, bt)
    return best


def _se_two_pass(x_flat, w1_t, w2_t, max_block_bytes, vmem_clamp):
    """Spatially tiled pool + scale when one (C, HW) slab exceeds the budget."""
    B, C, HW = x_flat.shape
    itemsize = jnp.dtype(x_flat.dtype).itemsize

    hw_tile = max(128, (max_block_bytes // (C * itemsize)) // 128 * 128)
    # TODO(synk): if even a 128-lane tile exceeds the budget (absurdly large C)
    # the channel axis would also need tiling; not implemented.
    if hw_tile >= HW:
        hw_tile = HW
    n_t = pl.cdiv(HW, hw_tile)
    block_bytes = C * hw_tile * itemsize
    vmem_limit = int(min(max(4 * block_bytes + (4 << 20), 16 << 20), vmem_clamp))

    # Pass 1: per-channel spatial sums, accumulated across hw tiles (P3).
    sums = pl.pallas_call(
        functools.partial(_pool_kernel, hw_total=HW, hw_tile=hw_tile),
        out_shape=jax.ShapeDtypeStruct((B, C, 1), jnp.float32),
        grid_spec=pltpu.PrefetchScalarGridSpec(
            num_scalar_prefetch=0,
            grid=(B, n_t),
            in_specs=[pl.BlockSpec((1, C, hw_tile), lambda b, t: (b, 0, t))],
            out_specs=pl.BlockSpec((1, C, 1), lambda b, t: (b, 0, 0)),
        ),
        compiler_params=pltpu.CompilerParams(
            dimension_semantics=("parallel", "arbitrary"),
            vmem_limit_bytes=vmem_limit,
        ),
    )(x_flat)

    # Tiny excitation in plain JAX (negligible vs. the two HBM-bound passes).
    y = sums[:, :, 0] * (1.0 / HW)                              # (B, C) f32
    h = jnp.maximum(jnp.dot(y, w1_t), 0.0)
    gate = jax.nn.sigmoid(jnp.dot(h, w2_t)).astype(x_flat.dtype)
    gate3 = gate[:, :, None]                                    # (B, C, 1)

    # Pass 2: apply the per-channel gate, tiled over (batch, hw tiles).
    out_flat = pl.pallas_call(
        _scale_kernel,
        out_shape=jax.ShapeDtypeStruct((B, C, HW), x_flat.dtype),
        grid_spec=pltpu.PrefetchScalarGridSpec(
            num_scalar_prefetch=0,
            grid=(B, n_t),
            in_specs=[pl.BlockSpec((1, C, hw_tile), lambda b, t: (b, 0, t)),
                      pl.BlockSpec((1, C, 1), lambda b, t: (b, 0, 0))],
            out_specs=pl.BlockSpec((1, C, hw_tile), lambda b, t: (b, 0, t)),
        ),
        compiler_params=pltpu.CompilerParams(
            dimension_semantics=("parallel", "parallel"),
            vmem_limit_bytes=vmem_limit,
        ),
    )(x_flat, gate3)
    return out_flat


def se_layer(x, w1, w2, *, _max_block_bytes=None):
    """SELayer forward.  x: (B, C, H, W) NCHW; w1: (C//r, C); w2: (C, C//r)."""
    B, C, H, W = x.shape
    HW = H * W
    C_red = w1.shape[0]

    x_flat = x.reshape(B, C, HW)                    # zero-copy view of NCHW
    # Pre-transpose + pre-cast weights once in XLA (tiny); no in-kernel casts.
    w1_t = jnp.transpose(w1).astype(jnp.float32)    # (C, C_red)
    w2_t = jnp.transpose(w2).astype(jnp.float32)    # (C_red, C)

    max_block_bytes, vmem_clamp, min_steps = _budgets()
    if _max_block_bytes is not None:                # test hook
        max_block_bytes = _max_block_bytes

    itemsize = jnp.dtype(x.dtype).itemsize
    per_batch_bytes = C * HW * itemsize
    weight_bytes = (w1_t.size + w2_t.size) * 4

    if per_batch_bytes > max_block_bytes:
        out_flat = _se_two_pass(x_flat, w1_t, w2_t, max_block_bytes, vmem_clamp)
        return out_flat.reshape(B, C, H, W)

    bt = _choose_bt(B, per_batch_bytes, max_block_bytes, min_steps)
    grid = (B // bt,)

    # Double-buffered in + out blocks, double-buffered (tiny) weights, slack.
    vmem_need = 4 * bt * per_batch_bytes + 2 * weight_bytes + (2 << 20)
    vmem_limit = int(min(max(vmem_need, 16 << 20), vmem_clamp))

    cost = pl.CostEstimate(
        flops=int(B * (2 * C * HW + 4 * C * C_red)),
        transcendentals=int(B * C),
        bytes_accessed=int(2 * B * C * HW * itemsize + weight_bytes),
    )

    out_flat = pl.pallas_call(
        _se_kernel,
        out_shape=jax.ShapeDtypeStruct((B, C, HW), x.dtype),
        grid_spec=pltpu.PrefetchScalarGridSpec(
            num_scalar_prefetch=0,
            grid=grid,
            in_specs=[
                pl.BlockSpec((bt, C, HW), lambda b: (b, 0, 0)),
                pl.BlockSpec((C, C_red), lambda b: (0, 0)),
                pl.BlockSpec((C_red, C), lambda b: (0, 0)),
            ],
            out_specs=pl.BlockSpec((bt, C, HW), lambda b: (b, 0, 0)),
        ),
        compiler_params=pltpu.CompilerParams(
            dimension_semantics=("parallel",),
            vmem_limit_bytes=vmem_limit,
        ),
        cost_estimate=cost,
    )(x_flat, w1_t, w2_t)

    return out_flat.reshape(B, C, H, W)


if __name__ == "__main__":
    def _reference(x, w1, w2):
        y = jnp.mean(x, axis=(2, 3))                    # (B, C)
        y = jnp.maximum(y @ w1.T, 0.0)                  # (B, C//r)
        y = jax.nn.sigmoid(y @ w2.T)                    # (B, C)
        return x * y[:, :, None, None]

    key = jax.random.PRNGKey(0)

    # Case 1: SELayer(channel=32, reduction=16), small spatial map.
    B, C, H, W, red = 2, 32, 16, 16, 16
    kx, k1, k2, key = jax.random.split(key, 4)
    x = jax.random.normal(kx, (B, C, H, W), dtype=jnp.float32)
    # nn.Linear(C, C//r, bias=False) / nn.Linear(C//r, C, bias=False):
    # weight shape is (out_features, in_features).
    w1 = jax.random.normal(k1, (C // red, C), dtype=jnp.float32) * 0.1
    w2 = jax.random.normal(k2, (C, C // red), dtype=jnp.float32) * 0.1
    out = se_layer(x, w1, w2)
    jax.block_until_ready(out)
    assert jnp.allclose(out, _reference(x, w1, w2), atol=1e-5, rtol=1e-5), \
        "mismatch vs reference (fused path)"

    # Case 2: larger batch -> can pick Bt > 1 (batched excitation matmuls).
    kx2, key = jax.random.split(key)
    x2 = jax.random.normal(kx2, (8, C, 8, 8), dtype=jnp.float32)
    out2 = se_layer(x2, w1, w2)
    jax.block_until_ready(out2)
    assert jnp.allclose(out2, _reference(x2, w1, w2), atol=1e-5, rtol=1e-5), \
        "mismatch vs reference (batched path)"

    # Case 3: force the spatially tiled two-pass fallback (20*20 = 400 lanes,
    # 128-lane tiles -> includes a masked partial last tile).
    kx3, key = jax.random.split(key)
    x3 = jax.random.normal(kx3, (2, C, 20, 20), dtype=jnp.float32)
    out3 = se_layer(x3, w1, w2, _max_block_bytes=8 << 10)
    jax.block_until_ready(out3)
    assert jnp.allclose(out3, _reference(x3, w1, w2), atol=1e-5, rtol=1e-5), \
        "mismatch vs reference (two-pass fallback)"

    print("KERNEL_OK")
</pallas_src>

<mosaic_0001>
module attributes {stable_mosaic.version = 11 : i64} {
  func.func @_se_kernel(%arg0: i32, %arg1: memref<1x32x256xf32, #tpu.memory_space<vmem>>, %arg2: memref<32x2xf32, #tpu.memory_space<vmem>>, %arg3: memref<2x32xf32, #tpu.memory_space<vmem>>, %arg4: memref<1x32x256xf32, #tpu.memory_space<vmem>>) attributes {dimension_semantics = [#tpu.dimension_semantics<parallel>], iteration_bounds = array<i64: 2>, scalar_prefetch = 0 : i64, scratch_operands = 0 : i64, tpu.core_type = #tpu.core_type<tc>, window_params = [{transform_indices = @transform_0, window_bounds = array<i64: 1, 32, 256>}, {pipeline_mode = #tpu.pipeline_mode<synchronous>, transform_indices = @transform_1, window_bounds = array<i64: 32, 2>}, {pipeline_mode = #tpu.pipeline_mode<synchronous>, transform_indices = @transform_2, window_bounds = array<i64: 2, 32>}, {transform_indices = @transform_3, window_bounds = array<i64: 1, 32, 256>}]} {
    %c0 = arith.constant 0 : index
    %c0_0 = arith.constant 0 : index
    %c0_1 = arith.constant 0 : index
    %0 = vector.load %arg1[%c0, %c0_0, %c0_1] : memref<1x32x256xf32, #tpu.memory_space<vmem>>, vector<1x32x256xf32>
    %cst = arith.constant dense<0.000000e+00> : vector<1x32xf32>
    %1 = vector.multi_reduction <add>, %0, %cst [2] : vector<1x32x256xf32> to vector<1x32xf32>
    %cst_2 = arith.constant 2.560000e+02 : f32
    %2 = vector.broadcast %cst_2 : f32 to vector<1x32xf32>
    %3 = arith.divf %1, %2 : vector<1x32xf32>
    %c0_3 = arith.constant 0 : index
    %c0_4 = arith.constant 0 : index
    %4 = vector.load %arg2[%c0_3, %c0_4] : memref<32x2xf32, #tpu.memory_space<vmem>>, vector<32x2xf32>
    %cst_5 = arith.constant dense<0.000000e+00> : vector<1x2xf32>
    %5 = tpu.matmul %3, %4, %cst_5 {dimension_numbers = #tpu.dot_dimension_numbers<[1], [0], [0], [1], [0, 0, 1, 1], [], []>} : vector<1x32xf32>, vector<32x2xf32>, vector<1x2xf32> -> vector<1x2xf32>
    %cst_6 = arith.constant 0.000000e+00 : f32
    %6 = vector.broadcast %cst_6 : f32 to vector<1x2xf32>
    %7 = arith.maximumf %5, %6 : vector<1x2xf32>
    %c0_7 = arith.constant 0 : index
    %c0_8 = arith.constant 0 : index
    %8 = vector.load %arg3[%c0_7, %c0_8] : memref<2x32xf32, #tpu.memory_space<vmem>>, vector<2x32xf32>
    %cst_9 = arith.constant dense<0.000000e+00> : vector<1x32xf32>
    %9 = tpu.matmul %7, %8, %cst_9 {dimension_numbers = #tpu.dot_dimension_numbers<[1], [0], [0], [1], [0, 0, 1, 1], [], []>} : vector<1x2xf32>, vector<2x32xf32>, vector<1x32xf32> -> vector<1x32xf32>
    %10 = arith.negf %9 : vector<1x32xf32>
    %11 = math.exp %10 : vector<1x32xf32>
    %cst_10 = arith.constant 1.000000e+00 : f32
    %12 = vector.broadcast %cst_10 : f32 to vector<1x32xf32>
    %13 = arith.addf %12, %11 : vector<1x32xf32>
    %14 = arith.divf %12, %13 : vector<1x32xf32>
    %c0_11 = arith.constant 0 : index
    %c0_12 = arith.constant 0 : index
    %c0_13 = arith.constant 0 : index
    %15 = vector.load %arg1[%c0_11, %c0_12, %c0_13] : memref<1x32x256xf32, #tpu.memory_space<vmem>>, vector<1x32x256xf32>
    %16 = vector.shape_cast %14 : vector<1x32xf32> to vector<1x32x1xf32>
    %17 = vector.broadcast %16 : vector<1x32x1xf32> to vector<1x32x256xf32>
    %18 = arith.mulf %15, %17 : vector<1x32x256xf32>
    %c0_14 = arith.constant 0 : index
    %c0_15 = arith.constant 0 : index
    %c0_16 = arith.constant 0 : index
    %19 = vector.load %arg4[%c0_14, %c0_15, %c0_16] : memref<1x32x256xf32, #tpu.memory_space<vmem>>, vector<1x32x256xf32>
    tpu.vector_store %arg4[%c0_14, %c0_15, %c0_16], %18 {strides = array<i32>} : memref<1x32x256xf32, #tpu.memory_space<vmem>>, vector<1x32x256xf32>,
    return
  }
  func.func @transform_0(%arg0: i32) -> (i32, i32, i32) {
    %c0_i32 = arith.constant 0 : i32
    %c0_i32_0 = arith.constant 0 : i32
    %c0_i32_1 = arith.constant 0 : i32
    return %arg0, %c0_i32, %c0_i32_0 : i32, i32, i32
  }
  func.func @transform_1(%arg0: i32) -> (i32, i32) {
    %c0_i32 = arith.constant 0 : i32
    %c0_i32_0 = arith.constant 0 : i32
    %c0_i32_1 = arith.constant 0 : i32
    return %c0_i32, %c0_i32_0 : i32, i32
  }
  func.func @transform_2(%arg0: i32) -> (i32, i32) {
    %c0_i32 = arith.constant 0 : i32
    %c0_i32_0 = arith.constant 0 : i32
    %c0_i32_1 = arith.constant 0 : i32
    return %c0_i32, %c0_i32_0 : i32, i32
  }
  func.func @transform_3(%arg0: i32) -> (i32, i32, i32) {
    %c0_i32 = arith.constant 0 : i32
    %c0_i32_0 = arith.constant 0 : i32
    %c0_i32_1 = arith.constant 0 : i32
    return %arg0, %c0_i32, %c0_i32_0 : i32, i32, i32
  }
}

</mosaic_0001>

<bundles_post_ra>
// kernel: tpu_custom_call.1
= control target key start
LH: loop header
LB: loop body
LE: loop exit
PB: predicated region body
PF: predicated region fallthrough
CT: control target
= control target key end

     0   :  { %8 = vsyncpa [#allocation3], 0  ;;  %s956_s0 = inlined_call_operand.hbm [shape: f32[2,32,256], index: 0, kind: input, shape index: {}]   ;;  %s957_s1 = inlined_call_operand.vmem [shape: f32[32,2], index: 1, kind: input, shape index: {}]   ;;  %s958_s2 = inlined_call_operand.vmem [shape: f32[2,32], index: 2, kind: input, shape index: {}]   ;;  %s959_s3 = inlined_call_operand.hbm [shape: f32[2,32,256], index: 3, kind: output, shape index: {}]  }
   0x1   :  { %10 = vsyncpa [#allocation3 + $0x1], 0 }
   0x2   :  { %11 = vsyncpa [#allocation4], 0 }
   0x3   :  { %13 = vsyncpa [#allocation4 + $0x1], 0  ;;  %s751_s12 = smov 0   ;;  %s753_s13 = smov 0  }
   0x4   :  { %s755_s14 = smov 0   ;;  %s757_s15 = smov 0  }
   0x5 LB: > { %s772_s16 = sadd.s32 4294967295, %s721_s15   ;;  %s530_s17 = sadd.s32 4294967294, %s721_s15   ;;  %s721_s15 = sphi %s757_s15, %s974_s15   ;;  %s717_s14 = sphi %s755_s14, %s973_s14   ;;  %s713_s13 = sphi %s753_s13, %s972_s13   ;;  %s709_s12 = sphi %s751_s12, %s971_s12  }
   0x6   : > { %s776_s18 = sadd.s32 1, %s721_s15   ;;  %s26_s19 = sadd.s32 1, %s717_s14 }
   0x7   : > { %s23_s20 = ssub.s32 %s721_s15, %s776_s18  ;;  %p33_p0 = scmp.ne.s32.totalorder %s717_s14, %s713_s13 }
   0x8   : > { %p24_p1 = scmp.eq.s32.totalorder %s23_s20, 0  ;;  %p34_p2 = scmp.eq.s32.totalorder %s721_s15, 0 }
   0x9   : > { %p39_p3 = scmp.ne.s32.totalorder %s713_s13, %s709_s12  ;;  %p40_p4 = scmp.eq.s32.totalorder %s772_s16, 0 }
   0xa   : > { %s788_s21 = scalar_select %p24_p1, %s717_s14, %s26_s19  }
   0xb   : > { %p790_p5 = por %p34_p2, %p33_p0  ;;  %p794_p6 = por %p40_p4, %p39_p3 }
   0xc   : > { %p105_p7 = scmp.eq.s32.totalorder %s772_s16, 1  ;;  %p111_p8 = scmp.eq.s32.totalorder %s530_s17, 1 }
   0xd   : > { %s963_s23 = scalar_select %p794_p6, 1, 0 }
   0xe   : > { %p585_p10 = scmp.lt.s32.totalorder %s721_s15, 2  ;;  %p801_p11 = por %p105_p7, %p33_p0 }
   0xf   : > { %p805_p12 = por %p111_p8, %p39_p3  ;;  %s137_s26 = sand.u32 1, %s717_s14  }
  0x10   : > { %s964_s24 = scalar_select %p801_p11, 1, 0 }
  0x11   : > { %s965_s25 = scalar_select %p805_p12, 1, 0 }
  0x12   : > { %s548_s27 = sshll.u32 %s721_s15, 10  ;;  %s533_s28 = sshll.u32 %s137_s26, 6 }
  0x13   : > { %s814_s4 = scalar_lea.hbm %s956_s0, %s548_s27  ;;  %s141_s5 = scalar_lea.vmem [#allocation2], %s533_s28 }
  0x14   : > { %s148_s6 = sshll.u32 %s141_s5, 4  ;;  %p818_p13 = pnand %p585_p10, %p790_p5  ;;  %s822_s6 = int_to_ptr.vmem [resolvable:$true] %s148_s6 }
  0x15   : > { %s824_s8 = scalar_lea.sflag [#allocation3], %s137_s26  ;;  %s629_s9 = scalar_lea.hbm %s814_s4, 1024 }
  0x16   : > { %p630_p0 = scmp.ne.s32.totalorder %s814_s4, %s629_s9  ;;  %p631_p1 = pneg %p818_p13 }
  0x17   : > { %s634_s17 = scalar_lea.hbm %s956_s0, 2048  ;;  %p635_p4 = scmp.lt.s32.totalorder %s814_s4, %s956_s0 }
  0x18   : > { %p632_p2 = pnand %p631_p1, %p630_p0  ;;  %p636_p5 = scmp.lt.s32.totalorder %s634_s17, %s629_s9 }
  0x1a   : > { %p633_p3 = pneg %p632_p2  ;;  %p637_p7 = por %p636_p5, %p635_p4 }
  0x1c   : > { %p638_p8 = pnand %p637_p7, %p633_p3 }
  0x1e   : > { %641 = shalt.err (!%p638_p8)
}
  0x1f   : > { %s642_s22 = scalar_lea.vmem %s822_s6, 1024  ;;  %s723_s26 = smov [#allocation2]  }
  0x20   : > { %p643_p10 = scmp.ne.s32.totalorder %s822_s6, %s642_s22  ;;  %s647_s27 = sshll.u32 %s723_s26, 4  ;;  %s648_s27 = int_to_ptr.vmem [resolvable:$false] %s647_s27 }
  0x21   : > { %s649_s28 = scalar_lea.vmem %s648_s27, 2048  ;;  %p650_p2 = scmp.lt.s32.totalorder %s822_s6, %s648_s27 }
  0x22   : > { %p645_p9 = pnand %p643_p10, %p631_p1  ;;  %p651_p12 = scmp.lt.s32.totalorder %s649_s28, %s642_s22 }
  0x24   : > { %p646_p0 = pneg %p645_p9  ;;  %p652_p11 = por %p651_p12, %p650_p2 }
  0x26   : > { %p653_p6 = pnand %p652_p11, %p646_p0 }
  0x28   : > { %656 = shalt.err (!%p653_p6)
}
  0x29   : > { %s724_s29 = smov 256   ;;  %s725_s30 = smov 16  }
  0x2a   : > { %580 = dma.hbm_to_vmem [thread:$0]  (!%p818_p13), %s814_s4, 1024, %s822_s6, %s824_s8, %s724_s29, %s724_s29, %s725_s30  }
  0x2b   : > { %p536_p9 = scmp.ge.s32.totalorder %s721_s15, 1  ;;  %p156_p1 = scmp.lt.s32.totalorder %s721_s15, 3 }
  0x2d   : > { %p157_p3 = pnand %p536_p9, %p156_p1 }
  0x2e   : > { %s848_s5 = sand.u32 (!%p157_p3), 1, %s713_s13   ;;  %p967_p6 = scmp.ne.s32.totalorder (!%p157_p3), %s963_s23, 0 }
  0x2f   : > { %160 = sbr.rel (%p157_p3) target bundleno = 766 (0x2fe), region = 32  ;;  %s537_s9 = sshll.u32 (!%p157_p3), %s848_s5, 6 }
  0x30   : > { %s163_s10 = scalar_lea.sflag (!%p157_p3), [#allocation3], %s848_s5  ;;  %s166_s11 = scalar_lea.vmem (!%p157_p3), [#allocation2], %s537_s9 }
  0x34   : > { %700 = dma.done.wait (%p967_p6), %s163_s10, 1024  }
  0x35   : > { %702 = vsyncadd (%p967_p6), %s163_s10, 4294966272  ;;  %v858_v0 = vld [vmem:[%s166_s11] sm:$0xff]  ;;  %v860_v1 = vld [vmem:[%s166_s11 + $0x8] sm:$0xff]  ;;  %v726_v12 = vmov 0.0   ;;  %vm727_vm0 = vmmov 0   ;;  %v222_v17 = vlaneseq  ;;  %vm233_vm1 = vcmask 130112  }
  0x36   : > { %v862_v2 = vld [vmem:[%s166_s11 + $0x20] sm:$0xff]  ;;  %v197_v3 = vadd.f32 %v860_v1, %v858_v0  ;;  %v866_v4 = vld [vmem:[%s166_s11 + $0x28] sm:$0xff]  ;;  %v868_v5 = vld [vmem:[%s166_s11 + $0x10] sm:$0xff]  ;;  %557 = vmatprep.subr.mxu0 %v726_v12  ;;  %568 = vmatprep.subr.mxu1 %v726_v12  ;;  %vm240_vm2 = vcmask 195712   ;;  %vm247_vm3 = vcmask 261312   ;;  %vm249_vm4 = vcmask 261120  }
  0x37   : > { %v870_v6 = vld [vmem:[%s166_s11 + $0x18] sm:$0xff]  ;;  %v203_v7 = vadd.f32 %v866_v4, %v862_v2  ;;  %v874_v8 = vld [vmem:[%s166_s11 + $0x30] sm:$0xff]  ;;  %v215_v15 = vld [vmem:[%s957_s1 + $0x8] sm:$0xff]  ;;  %565 = vmatprep.mubr.msk.f32.mxu0 %vm727_vm0, %v726_v12  ;;  %570 = vmatprep.mubr.msk.f32.mxu1 %vm727_vm0, %v726_v12  ;;  %v223_v18 = vand.u32 127, %v222_v17  ;;  %v225_v19 = vshrl.u32 %v222_v17, 7  ;;  %vm328_vm5 = vcmask 1041408  }
  0x38   : > { %v876_v9 = vld [vmem:[%s166_s11 + $0x38] sm:$0xff]  ;;  %198 = vadd.xlane.f32.xlu0 %v197_v3  ;;  %v200_v10 = vadd.f32 %v870_v6, %v868_v5  ;;  %v216_v14 = vld [vmem:[%s957_s1 + $0x10] sm:$0xff]  ;;  %v214_v16 = vld [vmem:[%s957_s1] sm:$0xff]  ;;  %vm324_vm6 = vcmask 15360   ;;  %s188_s27 = scalar_lea.vmem [#allocation5], %s537_s9  ;;  %s549_s29 = sshll.u32 %s772_s16, 10 }
  0x39   : > { %204 = vadd.xlane.f32.xlu1 %v203_v7  ;;  %v206_v11 = vadd.f32 %v876_v9, %v874_v8  ;;  %v217_v13 = vld [vmem:[%s957_s1 + $0x18] sm:$0xff]  ;;  %v228_v20 = vadd.s32 4294967288, %v223_v18  ;;  %v235_v22 = vadd.s32 4294967280, %v223_v18  ;;  %v242_v23 = vadd.s32 4294967272, %v223_v18  ;;  %v323_v42 = vld [vmem:[%s958_s2] sm:$0x3]  ;;  %s911_s10 = scalar_lea.hbm %s959_s3, %s549_s29 }
  0x3a   : > { %558 = vmatpush3.msra.mxu0 %v217_v13  ;;  %v226_v25 = vsub.s32 %v223_v18, %v225_v19  ;;  %569 = vmatpush3.msk.msra.mxu1 %vm328_vm5, %v323_v42  ;;  %v410_v51 = vsub.s32 0, %v225_v19  ;;  %s457_s28 = sshll.u32 %s188_s27, 4  ;;  %s444_s16 = scalar_lea.sflag [#allocation4], %s848_s5  ;;  %s906_s28 = int_to_ptr.vmem [resolvable:$true] %s457_s28 }
  0x3b   : > { %559 = vmatprep.subr.mxu0 %v726_v12  ;;  %v231_v27 = vsub.s32 %v228_v20, %v225_v19  ;;  %v238_v28 = vsub.s32 %v235_v22, %v225_v19  ;;  %v245_v31 = vsub.s32 %v242_v23, %v225_v19  ;;  %s657_s11 = scalar_lea.vmem %s906_s28, 1024  ;;  %p968_p12 = scmp.ne.s32.totalorder %s964_s24, 0 }
  0x3c   : > { %201 = vadd.xlane.f32.xlu0 %v200_v10  ;;  %560 = vmatpush3.msra.mxu0 %v216_v14  ;;  %p658_p11 = scmp.ne.s32.totalorder %s906_s28, %s657_s11  ;;  %s728_s23 = smov [#allocation5]  }
  0x3d   : > { %207 = vadd.xlane.f32.xlu1 %v206_v11  ;;  %561 = vmatprep.subr.mxu0 %v726_v12  ;;  %s661_s4 = sshll.u32 %s728_s23, 4  ;;  %s662_s4 = int_to_ptr.vmem [resolvable:$false] %s661_s4 }
  0x3e   : > { %562 = vmatpush3.msra.mxu0 %v215_v15  ;;  %p659_p13 = pnand %p658_p11, %p968_p12  ;;  %s663_s6 = scalar_lea.vmem %s662_s4, 2048 }
  0x3f   : > { %563 = vmatprep.subr.mxu0 %v726_v12  ;;  %p664_p5 = scmp.lt.s32.totalorder %s906_s28, %s662_s4  ;;  %p665_p7 = scmp.lt.s32.totalorder %s663_s6, %s657_s11 }
  0x40   : > { %564 = vmatpush3.msra.mxu0 %v214_v16  ;;  %p660_p4 = pneg %p659_p13 }
  0x41   : > { %p666_p8 = por %p665_p7, %p664_p5 }
  0x43   : > { %p667_p10 = pnand %p666_p8, %p660_p4 }
  0xc1   : > { %v199_v21 = vpop.xlane.xlu0 %198 }
  0xc2   : > { %v205_v24 = vpop.xlane.xlu1 %204  ;;  %v210_v26 = vmul.f32 0.00390625, %v199_v21 }
  0xc3   : > { %v212_v29 = vmul.f32 0.00390625, %v205_v24 }
  0xc4   : > { %v227_v35 = vrot.slane %v210_v26, %v226_v25 }
  0xc5   : > { %v202_v30 = vpop.xlane.xlu0 %201  ;;  %v239_v37 = vrot.slane %v212_v29, %v238_v28 }
  0xc6   : > { %v211_v32 = vmul.f32 0.00390625, %v202_v30  ;;  %v208_v33 = vpop.xlane.xlu1 %207 }
  0xc7   : > { %v213_v34 = vmul.f32 0.00390625, %v208_v33 }
  0xc8   : > { %v232_v36 = vrot.slane %v211_v32, %v231_v27 }
  0xc9   : > { %v246_v38 = vrot.slane %v213_v34, %v245_v31 }
  0xca   : > { %v234_v39 = vsel %vm233_vm1, %v232_v36, %v227_v35 }
  0xcb   : > { %v241_v40 = vsel %vm240_vm2, %v239_v37, %v234_v39 }
  0xcc   : > { %v248_v41 = vsel %vm247_vm3, %v246_v38, %v241_v40 }
  0xcd   : > { %566 = vmatmul.mubr.msk.f32.vlgmr.msra.gmra.mxu0 %vm249_vm4, %v248_v41 }
 0x18d   : > { %v318_v43 = vpop.f32.mrf.mxu0 }
 0x18e   : > { %v322_v44 = vmax.f32 %v318_v43, 0.0 }
 0x18f   : > { %v567_v45 = vpop.f32.mrf.mxu0 }
 0x190   : > { %571 = vmatmul.mubr.msk.f32.vlgmr.msra.gmra.mxu1 %vm324_vm6, %v322_v44 }
 0x250   : > { %v398_v46 = vpop.f32.mrf.mxu1 }
 0x251   : > { %v542_v47 = vmul.f32 -1.442695, %v398_v46 }
 0x252   : > { %v572_v48 = vpop.f32.mrf.mxu1 }
 0x253   : > { %625 = vpow2.f32 %v542_v47 }
 0x260   : > { %v626_v49 = vpop.eup %625 }
 0x261   : > { %v405_v50 = vadd.f32 1.0, %v626_v49 }
 0x263   : > { %627 = vrcp.f32 %v405_v50 }
 0x270   : > { %v628_v52 = vpop.eup %627 }
 0x271   : > { %v411_v53 = vrot.slane %v628_v52, %v410_v51 }
 0x273   : > { %417 = vbcast.lane.b32.xlu1 %v411_v53, 264  ;;  %413 = vbcast.lane.b32.xlu0 %v411_v53, 256 }
 0x277   : > { %421 = vbcast.lane.b32.xlu1 %v411_v53, 272 }
 0x27b   : > { %425 = vbcast.lane.b32.xlu1 %v411_v53, 280 }
 0x2e5   : > { %v418_v54 = vpop.permute.xlu1 %417  ;;  %v414_v55 = vpop.permute.xlu0 %413 }
 0x2e6   : > { %v429_v56 = vmul.f32 %v418_v54, %v868_v5  ;;  %v430_v57 = vmul.f32 %v418_v54, %v870_v6  ;;  %v427_v58 = vmul.f32 %v414_v55, %v858_v0  ;;  %v428_v59 = vmul.f32 %v414_v55, %v860_v1 }
 0x2e8   : > { %437 = vst [vmem:[%s188_s27 + $0x10] sm:$0xff] %v429_v56  ;;  %438 = vst [vmem:[%s188_s27 + $0x18] sm:$0xff] %v430_v57 }
 0x2e9   : > { %435 = vst [vmem:[%s188_s27] sm:$0xff] %v427_v58  ;;  %436 = vst [vmem:[%s188_s27 + $0x8] sm:$0xff] %v428_v59  ;;  %v422_v60 = vpop.permute.xlu1 %421 }
 0x2ea   : > { %v431_v61 = vmul.f32 %v422_v60, %v862_v2  ;;  %v432_v62 = vmul.f32 %v422_v60, %v866_v4 }
 0x2ec   : > { %439 = vst [vmem:[%s188_s27 + $0x20] sm:$0xff] %v431_v61  ;;  %440 = vst [vmem:[%s188_s27 + $0x28] sm:$0xff] %v432_v62 }
 0x2ed   : > { %v426_v63 = vpop.permute.xlu1 %425 }
 0x2ee   : > { %v433_v0 = vmul.f32 %v426_v63, %v874_v8  ;;  %v434_v1 = vmul.f32 %v426_v63, %v876_v9 }
 0x2f0   : > { %441 = vst [vmem:[%s188_s27 + $0x30] sm:$0xff] %v433_v0  ;;  %442 = vst [vmem:[%s188_s27 + $0x38] sm:$0xff] %v434_v1 }
 0x2f1   : > { %670 = shalt.err (!%p667_p10)
}
 0x2f2   : > { %s671_s7 = scalar_lea.hbm %s911_s10, 1024  ;;  %s675_s19 = scalar_lea.hbm %s959_s3, 2048 }
 0x2f3   : > { %p672_p0 = scmp.ne.s32.totalorder %s911_s10, %s671_s7  ;;  %p676_p1 = scmp.lt.s32.totalorder %s911_s10, %s959_s3 }
 0x2f4   : > { %p677_p3 = scmp.lt.s32.totalorder %s675_s19, %s671_s7 }
 0x2f5   : > { %p673_p2 = pnand %p672_p0, %p968_p12 }
 0x2f6   : > { %p678_p6 = por %p677_p3, %p676_p1 }
 0x2f7   : > { %p674_p9 = pneg %p673_p2 }
 0x2f9   : > { %p679_p11 = pnand %p678_p6, %p674_p9 }
 0x2fb   : > { %682 = shalt.err (!%p679_p11)
}
 0x2fc   : > { %s729_s26 = smov 256   ;;  %s730_s27 = smov 16  }
 0x2fd   : > { %575 = dma.vmem_to_hbm [thread:$0]  (%p968_p12), %s906_s28, 1024, %s911_s10, %s444_s16, %s729_s26, %s729_s26, %s730_s27  }
 0x2fe PF: > { %s472_s29 = sand.u32 1, %s709_s12   ;;  %p969_p13 = scmp.ne.s32.totalorder %s965_s25, 0 }
 0x2ff   : > { %p970_p4 = scmp.ge.s32.totalorder %s721_s15, 2  ;;  %s473_s30 = scalar_lea.sflag [#allocation4], %s472_s29 }
 0x301   : > { %p582_p5 = pnand %p970_p4, %p969_p13 }
 0x303   : > { %p583_p7 = pneg %p582_p5 }
 0x305   : > { %704 = dma.done.wait (%p583_p7), %s473_s30, 1024  }
 0x306   : > { %706 = vsyncadd (%p583_p7), %s473_s30, 4294966272  ;;  %p16_p8 = scmp.ge.s32.totalorder %s776_s18, 4   ;;  %s971_s12 = smov %s713_s13 }
 0x307   : > { %s972_s13 = smov %s717_s14  ;;  %s973_s14 = smov %s788_s21 }
 0x308   : > { %s974_s15 = smov %s776_s18  ;;  %18 = sbr.rel (!%p16_p8) target bundleno = 5 (0x5), region = 77 }
 0x30d   :  { %478 = vsyncpa [#allocation3], 1 }
 0x30e   :  { %480 = vsyncpa [#allocation3 + $0x1], 1 }
 0x30f   :  { %481 = vsyncpa [#allocation4], 1 }
 0x310   :  { %483 = vsyncpa [#allocation4 + $0x1], 1 }

</bundles_post_ra>
